<compile_context>
chip_gen: v7x
topology: tpu7x:2x2x1
jax: 0.10.0
libtpu: 0.0.40
codegen_flags: <defaults>
</compile_context>

<pallas_src>
import math

import jax
import jax.numpy as jnp
from jax.experimental import pallas as pl
from jax.experimental.pallas import tpu as pltpu


def unflatten(x, size, h, w):
    """Default path: metadata-only reshape (what torch .view amounts to)."""
    return jnp.reshape(x, (-1, size, h, w))


def _plan_row_chunks(num_rows, row_bytes, *, max_chunks=8, min_chunk_bytes=1 << 20):
    """Split `num_rows` rows into up to `max_chunks` contiguous chunks of at
    least ~`min_chunk_bytes` each (big enough to amortize DMA descriptor
    cost); tiny buffers collapse to a single chunk. Chunk boundaries are
    8-row aligned when possible (HBM sublane-tile aligned)."""
    total_bytes = num_rows * row_bytes
    n = int(max(1, min(max_chunks, num_rows, total_bytes // min_chunk_bytes)))
    base = num_rows // n
    if base >= 8:
        base = (base // 8) * 8
    sizes = [base] * n
    sizes[-1] = num_rows - base * (n - 1)
    starts = [base * i for i in range(n)]
    return starts, sizes


def _make_dma_copy_kernel(starts, sizes):
    """Kernel factory: one HBM->HBM async copy per row-chunk; start all DMAs
    before waiting on any so multiple DMA streams are in flight."""
    n = len(starts)

    def kernel(x_hbm, o_hbm, sems):
        copies = []
        for c in range(n):
            rows = pl.ds(starts[c], sizes[c])
            cp = pltpu.make_async_copy(x_hbm.at[rows], o_hbm.at[rows], sems.at[c])
            cp.start()
            copies.append(cp)
        for cp in copies:
            cp.wait()

    return kernel


def unflatten_copy(x, size, h, w, *, max_chunks=8):
    """Pallas fusion-anchor path: materialize the copy with pure HBM->HBM DMAs,
    then apply the free metadata reshape to (-1, size, h, w)."""
    chw = size * h * w
    total = math.prod(x.shape)
    assert total % chw == 0, "input numel must be divisible by size*h*w"
    b = total // chw

    # Metadata-only for contiguous inputs (same memory order as torch .view);
    # a non-contiguous input would force XLA to materialize a copy here.
    x_flat = x.reshape(b, chw)

    dtype_bytes = jnp.dtype(x.dtype).itemsize
    starts, sizes = _plan_row_chunks(b, chw * dtype_bytes, max_chunks=max_chunks)
    n_chunks = len(starts)

    out_flat = pl.pallas_call(
        _make_dma_copy_kernel(starts, sizes),
        out_shape=jax.ShapeDtypeStruct((b, chw), x.dtype),
        # Both operands stay in HBM: no BlockSpec tiling, no VMEM staging.
        in_specs=[pl.BlockSpec(memory_space=pl.ANY)],
        out_specs=pl.BlockSpec(memory_space=pl.ANY),
        scratch_shapes=[pltpu.SemaphoreType.DMA((n_chunks,))],
        cost_estimate=pl.CostEstimate(
            flops=0,
            transcendentals=0,
            bytes_accessed=2 * total * dtype_bytes,
        ),
        # Production fused path (caller no longer needs x):
        #   input_output_aliases={0: 0}
        # donates the input buffer -> saves the output allocation / peak HBM
        # footprint; HBM traffic is unchanged (every byte still read+written).
    )(x_flat)

    # Free metadata-only reshape to NCHW outside the kernel.
    return out_flat.reshape(b, size, h, w)


if __name__ == "__main__":
    # Module params (deterministic, synthetic): UnFlatten(size=4, h=16, w=16)
    SIZE, H, W = 4, 16, 16
    B = 2

    key = jax.random.PRNGKey(0)
    # Input as it would arrive from the preceding Linear layer: (B, size*h*w)
    x = jax.random.normal(key, (B, SIZE * H * W), dtype=jnp.float32)

    # Reference: pure JAX reshape (== torch .view semantics for contiguous input)
    y_ref = x.reshape(-1, SIZE, H, W)

    # 1) Recommended path (no kernel at all).
    y_view = unflatten(x, SIZE, H, W)
    assert y_view.shape == (B, SIZE, H, W), y_view.shape
    assert jnp.array_equal(y_view, y_ref), "mismatch vs reference (view path)"

    # 2) Pallas fusion-anchor path (pure HBM->HBM DMA copy).
    y = jax.block_until_ready(unflatten_copy(x, SIZE, H, W))
    assert y.shape == (B, SIZE, H, W), y.shape
    assert y.dtype == x.dtype
    assert jnp.array_equal(y, y_ref), "mismatch vs reference (DMA copy path)"

    # Awkward shapes from the perf review: chw=147 (not a multiple of 128),
    # batch=5 (not a multiple of 8). The DMA path handles them identically.
    s2, h2, w2, b2 = 3, 7, 7, 5
    x2 = jax.random.normal(jax.random.PRNGKey(0), (b2, s2 * h2 * w2),
                           dtype=jnp.float32)
    y2 = jax.block_until_ready(unflatten_copy(x2, s2, h2, w2))
    assert jnp.array_equal(y2, x2.reshape(-1, s2, h2, w2)), "mismatch (odd shapes)"

    print("KERNEL_OK")
</pallas_src>

<mosaic_0001>
module attributes {stable_mosaic.version = 11 : i64} {
  func.func @kernel(%arg0: memref<2x1024xf32, #tpu.memory_space<any>>, %arg1: memref<2x1024xf32, #tpu.memory_space<any>>, %arg2: memref<1x!tpu.dma_semaphore, #tpu.memory_space<semaphore_mem>>) attributes {dimension_semantics = [], scalar_prefetch = 0 : i64, scratch_operands = 1 : i64, tpu.core_type = #tpu.core_type<tc>} {
    %c0_i32 = arith.constant 0 : i32
    %c0_i32_0 = arith.constant 0 : i32
    %c0_i32_1 = arith.constant 0 : i32
    %0 = tpu.memref_slice %arg0[%c0_i32_0, %c0_i32_1] : memref<2x1024xf32, #tpu.memory_space<any>> -> memref<2x1024xf32, #tpu.memory_space<any>>
    %c0_i32_2 = arith.constant 0 : i32
    %c0_i32_3 = arith.constant 0 : i32
    %1 = tpu.memref_slice %arg1[%c0_i32_2, %c0_i32_3] : memref<2x1024xf32, #tpu.memory_space<any>> -> memref<2x1024xf32, #tpu.memory_space<any>>
    %2 = tpu.memref_slice %arg2[%c0_i32] : memref<1x!tpu.dma_semaphore, #tpu.memory_space<semaphore_mem>> -> memref<1x!tpu.dma_semaphore, #tpu.memory_space<semaphore_mem>>
    %3 = tpu.memref_squeeze %2 : memref<1x!tpu.dma_semaphore, #tpu.memory_space<semaphore_mem>> -> memref<!tpu.dma_semaphore, #tpu.memory_space<semaphore_mem>>
    tpu.enqueue_dma source(%0 : memref<2x1024xf32, #tpu.memory_space<any>>) target(%1 : memref<2x1024xf32, #tpu.memory_space<any>>) target_semaphore(%3 : memref<!tpu.dma_semaphore, #tpu.memory_space<semaphore_mem>>)
    %c0_i32_4 = arith.constant 0 : i32
    %c0_i32_5 = arith.constant 0 : i32
    %c0_i32_6 = arith.constant 0 : i32
    %4 = tpu.memref_slice %arg0[%c0_i32_5, %c0_i32_6] : memref<2x1024xf32, #tpu.memory_space<any>> -> memref<2x1024xf32, #tpu.memory_space<any>>
    %c0_i32_7 = arith.constant 0 : i32
    %c0_i32_8 = arith.constant 0 : i32
    %5 = tpu.memref_slice %arg1[%c0_i32_7, %c0_i32_8] : memref<2x1024xf32, #tpu.memory_space<any>> -> memref<2x1024xf32, #tpu.memory_space<any>>
    %6 = tpu.memref_slice %arg2[%c0_i32_4] : memref<1x!tpu.dma_semaphore, #tpu.memory_space<semaphore_mem>> -> memref<1x!tpu.dma_semaphore, #tpu.memory_space<semaphore_mem>>
    %7 = tpu.memref_squeeze %6 : memref<1x!tpu.dma_semaphore, #tpu.memory_space<semaphore_mem>> -> memref<!tpu.dma_semaphore, #tpu.memory_space<semaphore_mem>>
    tpu.wait_dma2 semaphore(%7 : memref<!tpu.dma_semaphore, #tpu.memory_space<semaphore_mem>>) src(%4 : memref<2x1024xf32, #tpu.memory_space<any>>) dst(%5 : memref<2x1024xf32, #tpu.memory_space<any>>)
    return
  }
}

</mosaic_0001>

<bundles_post_ra>
// kernel: tpu_custom_call.1
= control target key start
LH: loop header
LB: loop body
LE: loop exit
PB: predicated region body
PF: predicated region fallthrough
CT: control target
= control target key end

     0   :  { %s35_s6 = smov [#allocation2]   ;;  %s36_s7 = smov [#allocation3]   ;;  %s54_s0 = inlined_call_operand.hbm [shape: f32[2,1024], index: 0, kind: input, shape index: {}]   ;;  %s55_s1 = inlined_call_operand.hbm [shape: f32[2,1024], index: 1, kind: output, shape index: {}]  }
   0x1   :  { %s37_s8 = smov 0  }
   0x2   :  { %18 = dma.general %s54_s0, 256, %s55_s1, %s35_s6, %s36_s7, [#allocation4], %s37_s8, 0  }
   0x3   :  { %33 = dma.done.wait [#allocation2], 256 }
   0x4   :  { %34 = vsyncadd [#allocation2], 4294967040 }
   0x5   :  { %23 = vsyncmov [#allocation2] }
   0x8   :  { %s24_s13 = vpop.sfrf %23 }
   0x9   :  { %p29_p0 = scmp.ne.s32.totalorder %s24_s13, 0 }
   0xb   :  { %28 = shalt.err (%p29_p0)  }

</bundles_post_ra>
